<compile_context>
chip_gen: v7x
topology: tpu7x:2x2x1
jax: 0.10.0
libtpu: 0.0.40
codegen_flags: <defaults>
</compile_context>

<pallas_src>
import jax
import jax.numpy as jnp
from jax.experimental import pallas as pl
from jax.experimental.pallas import tpu as pltpu


H = 128      # hidden width of nn.Linear(state_space, 128)
KA = 8       # padded contraction depth: S features + 1 bias row + zero pad
LANE = 128   # TPU lane width


def _round_up(n, m):
    return (n + m - 1) // m * m


def critic_kernel(xt_ref, w1a_ref, w2a_ref, b2_ref, o_ref, h_ref):
    # xt_ref : [KA, TB] f32 VMEM  rows 0..S-1 = x^T, row S = ones, rest zeros
    # w1a_ref: [H, KA]  f32 VMEM  cols 0..S-1 = w1^T, col S = b1, rest zeros
    # w2a_ref: [8, H]   f32 VMEM  row 0 = value-head weights, rows 1..7 zero
    # b2_ref : [1]      f32 SMEM  value-head bias (scalar)
    # o_ref  : [8, TB]  f32 VMEM  row 0 = state values, lane-dense
    # h_ref  : [H, TB]  f32 VMEM scratch (hidden activations for this tile)

    # Layer 1 (+ bias via the augmented ones row) on the MXU; ReLU on the VPU.
    # Result streams through vregs into the VMEM scratch, so no large live
    # accumulator in the register file.
    h_ref[...] = jnp.maximum(
        jnp.dot(w1a_ref[...], xt_ref[...], preferred_element_type=jnp.float32),
        0.0,
    )

    # Layer 2 on the MXU: [8, H] @ [H, TB] -> [8, TB] (row 0 is the real
    # head; padding to 8 rows keeps the matmul sublane-aligned).  The scalar
    # b2 add is a free sreg splat on the VPU; the store is a full unmasked
    # lane-dense block.
    o_ref[...] = (
        jnp.dot(w2a_ref[...], h_ref[...], preferred_element_type=jnp.float32)
        + b2_ref[0]
    )


def critic_forward(x, w1, b1, w2t, b2, *, tile_b=2048):
    """x: [B, S] f32 -> state_values: [B, 1] f32.

    w1: [S, H], b1: [1, H], w2t: [1, H] (value-head weight as a row), b2: [1].
    """
    B, S = x.shape
    assert w1.shape == (S, H)
    assert b1.shape == (1, H)
    assert w2t.shape == (1, H)
    assert b2.shape == (1,)
    assert S + 1 <= KA, "state_space must fit the padded contraction depth"

    f32 = jnp.float32

    # Augmented, transposed layer-1 weights: [H, KA] = [ w1^T | b1 | 0 ].
    w1a = jnp.concatenate(
        [w1.T.astype(f32),
         b1.reshape(H, 1).astype(f32),
         jnp.zeros((H, KA - S - 1), f32)],
        axis=1,
    )
    # Value head padded to 8 MXU rows (row 0 real, rows 1..7 zero).
    w2a = jnp.concatenate([w2t.astype(f32), jnp.zeros((7, H), f32)], axis=0)
    b2 = b2.astype(f32)

    grid_path = B > tile_b
    b_pad = _round_up(B, tile_b if grid_path else LANE)

    # Transposed, bias-augmented input, batch on lanes: [KA, b_pad].
    xt = jnp.concatenate(
        [x.T.astype(f32),
         jnp.ones((1, B), f32),            # bias row
         jnp.zeros((KA - S - 1, B), f32)], # pad contraction to KA=8
        axis=0,
    )
    if b_pad != B:
        xt = jnp.pad(xt, ((0, 0), (0, b_pad - B)))

    if not grid_path:
        # Single block, no grid: zero per-step bookkeeping; lane width
        # padded up to a multiple of 128 so all stores are unmasked.
        out = pl.pallas_call(
            critic_kernel,
            out_shape=jax.ShapeDtypeStruct((8, b_pad), f32),
            in_specs=[
                pl.BlockSpec(memory_space=pltpu.MemorySpace.VMEM),  # xt
                pl.BlockSpec(memory_space=pltpu.MemorySpace.VMEM),  # w1a
                pl.BlockSpec(memory_space=pltpu.MemorySpace.VMEM),  # w2a
                pl.BlockSpec(memory_space=pltpu.MemorySpace.SMEM),  # b2
            ],
            out_specs=pl.BlockSpec(memory_space=pltpu.MemorySpace.VMEM),
            scratch_shapes=[pltpu.VMEM((H, b_pad), f32)],
        )(xt, w1a, w2a, b2)
        return out[0, :B].reshape(B, 1)

    # Batch-tiled path for large rollout batches: big lane-dense batch tiles
    # (x tile is only KA * tile_b * 4 bytes), weights VMEM-resident, batch
    # axis "parallel" so >=2 tiles shard across TensorCores on v7x.
    num_tiles = b_pad // tile_b
    out = pl.pallas_call(
        critic_kernel,
        out_shape=jax.ShapeDtypeStruct((8, b_pad), f32),
        grid=(num_tiles,),
        in_specs=[
            pl.BlockSpec((KA, tile_b), lambda i: (0, i)),        # xt tile
            pl.BlockSpec((H, KA), lambda i: (0, 0)),             # w1a
            pl.BlockSpec((8, H), lambda i: (0, 0)),              # w2a
            pl.BlockSpec(memory_space=pltpu.MemorySpace.SMEM),   # b2 scalar
        ],
        out_specs=pl.BlockSpec((8, tile_b), lambda i: (0, i)),   # lane-dense
        scratch_shapes=[pltpu.VMEM((H, tile_b), f32)],
        compiler_params=pltpu.CompilerParams(
            dimension_semantics=("parallel",),
        ),
    )(xt, w1a, w2a, b2)
    return out[0, :B].reshape(B, 1)


def critic_forward_ref(x, w1, b1, w2t, b2):
    """Pure-JAX reference of the PyTorch forward."""
    h = jnp.maximum(
        jnp.dot(x, w1, precision=jax.lax.Precision.HIGHEST) + b1, 0.0
    )
    return jnp.dot(h, w2t.T, precision=jax.lax.Precision.HIGHEST) + b2


if __name__ == "__main__":
    key = jax.random.PRNGKey(0)
    k_x, k_w1, k_b1, k_w2, k_b2, k_x2 = jax.random.split(key, 6)

    S = 4    # CartPole-v0 observation_space.shape[0]
    B = 8    # small batch of states

    def bf16_round(a):
        # Test data is rounded to bf16-representable f32 so the kernel's MXU
        # contractions (which may execute the f32 multiply as bf16 passes)
        # agree closely with the f32 HIGHEST-precision reference.
        return a.astype(jnp.bfloat16).astype(jnp.float32)

    lim1 = 1.0 / S ** 0.5
    lim2 = 1.0 / H ** 0.5
    x = bf16_round(jax.random.normal(k_x, (B, S), dtype=jnp.float32))
    w1 = bf16_round(jax.random.uniform(k_w1, (S, H), jnp.float32, -lim1, lim1))
    b1 = bf16_round(jax.random.uniform(k_b1, (1, H), jnp.float32, -lim1, lim1))
    w2t = bf16_round(jax.random.uniform(k_w2, (1, H), jnp.float32, -lim2, lim2))
    b2 = bf16_round(jax.random.uniform(k_b2, (1,), jnp.float32, -lim2, lim2))

    # Small-batch (grid-less) path.
    out = jax.block_until_ready(critic_forward(x, w1, b1, w2t, b2))
    ref = critic_forward_ref(x, w1, b1, w2t, b2)
    assert out.shape == (B, 1)
    assert jnp.allclose(out, ref, atol=5e-3, rtol=5e-3), "small-batch mismatch"

    # Large rollout batch: explicit small tile_b exercises the batch-tiled
    # grid path (4 tiles) including the batch padding / slicing.
    B_big = 1537
    x_big = bf16_round(jax.random.normal(k_x2, (B_big, S), dtype=jnp.float32))
    out_big = jax.block_until_ready(
        critic_forward(x_big, w1, b1, w2t, b2, tile_b=512))
    ref_big = critic_forward_ref(x_big, w1, b1, w2t, b2)
    assert out_big.shape == (B_big, 1)
    assert jnp.allclose(out_big, ref_big, atol=5e-3, rtol=5e-3), "tiled mismatch"

    # Same batch through the default (single-block) path.
    out_default = jax.block_until_ready(critic_forward(x_big, w1, b1, w2t, b2))
    assert jnp.allclose(out_default, ref_big, atol=5e-3, rtol=5e-3), \
        "default-path mismatch"

    print("KERNEL_OK")
</pallas_src>

<mosaic_0001>
module attributes {stable_mosaic.version = 11 : i64} {
  func.func @critic_kernel(%arg0: memref<8x128xf32, #tpu.memory_space<vmem>>, %arg1: memref<128x8xf32, #tpu.memory_space<vmem>>, %arg2: memref<8x128xf32, #tpu.memory_space<vmem>>, %arg3: memref<1xf32, #tpu.memory_space<smem>>, %arg4: memref<8x128xf32, #tpu.memory_space<vmem>>, %arg5: memref<128x128xf32, #tpu.memory_space<vmem>>) attributes {dimension_semantics = [], scalar_prefetch = 0 : i64, scratch_operands = 1 : i64, tpu.core_type = #tpu.core_type<tc>} {
    %c0 = arith.constant 0 : index
    %c0_0 = arith.constant 0 : index
    %0 = vector.load %arg1[%c0, %c0_0] : memref<128x8xf32, #tpu.memory_space<vmem>>, vector<128x8xf32>
    %c0_1 = arith.constant 0 : index
    %c0_2 = arith.constant 0 : index
    %1 = vector.load %arg0[%c0_1, %c0_2] : memref<8x128xf32, #tpu.memory_space<vmem>>, vector<8x128xf32>
    %cst = arith.constant dense<0.000000e+00> : vector<128x128xf32>
    %2 = tpu.matmul %0, %1, %cst {dimension_numbers = #tpu.dot_dimension_numbers<[1], [0], [0], [1], [0, 0, 1, 1], [], []>} : vector<128x8xf32>, vector<8x128xf32>, vector<128x128xf32> -> vector<128x128xf32>
    %cst_3 = arith.constant 0.000000e+00 : f32
    %3 = vector.broadcast %cst_3 : f32 to vector<128x128xf32>
    %4 = arith.maximumf %2, %3 : vector<128x128xf32>
    %c0_4 = arith.constant 0 : index
    %c0_5 = arith.constant 0 : index
    %5 = vector.load %arg5[%c0_4, %c0_5] : memref<128x128xf32, #tpu.memory_space<vmem>>, vector<128x128xf32>
    tpu.vector_store %arg5[%c0_4, %c0_5], %4 {strides = array<i32>} : memref<128x128xf32, #tpu.memory_space<vmem>>, vector<128x128xf32>,
    %c0_6 = arith.constant 0 : index
    %c0_7 = arith.constant 0 : index
    %6 = vector.load %arg2[%c0_6, %c0_7] : memref<8x128xf32, #tpu.memory_space<vmem>>, vector<8x128xf32>
    %c0_8 = arith.constant 0 : index
    %c0_9 = arith.constant 0 : index
    %7 = vector.load %arg5[%c0_8, %c0_9] : memref<128x128xf32, #tpu.memory_space<vmem>>, vector<128x128xf32>
    %cst_10 = arith.constant dense<0.000000e+00> : vector<8x128xf32>
    %8 = tpu.matmul %6, %7, %cst_10 {dimension_numbers = #tpu.dot_dimension_numbers<[1], [0], [0], [1], [0, 0, 1, 1], [], []>} : vector<8x128xf32>, vector<128x128xf32>, vector<8x128xf32> -> vector<8x128xf32>
    %c0_11 = arith.constant 0 : index
    %9 = memref.load %arg3[%c0_11] : memref<1xf32, #tpu.memory_space<smem>>
    %10 = vector.broadcast %9 : f32 to vector<8x128xf32>
    %11 = arith.addf %8, %10 : vector<8x128xf32>
    %c0_12 = arith.constant 0 : index
    %c0_13 = arith.constant 0 : index
    %12 = vector.load %arg4[%c0_12, %c0_13] : memref<8x128xf32, #tpu.memory_space<vmem>>, vector<8x128xf32>
    tpu.vector_store %arg4[%c0_12, %c0_13], %11 {strides = array<i32>} : memref<8x128xf32, #tpu.memory_space<vmem>>, vector<8x128xf32>,
    return
  }
}

</mosaic_0001>

<bundles_post_ra>
// kernel: tpu_custom_call.1
= control target key start
LH: loop header
LB: loop body
LE: loop exit
PB: predicated region body
PF: predicated region fallthrough
CT: control target
= control target key end

     0   :  { %vm36_vm0 = vcmask 64512   ;;  %s643_s0 = inlined_call_operand.vmem [shape: f32[8,128], index: 0, kind: input, shape index: {}]   ;;  %s644_s1 = inlined_call_operand.vmem [shape: f32[128,8], index: 1, kind: input, shape index: {}]   ;;  %s645_s2 = inlined_call_operand.vmem [shape: f32[8,128], index: 2, kind: input, shape index: {}]   ;;  %s646_s3 = inlined_call_operand.<no memory space> [shape: f32[1], index: 3, kind: input, shape index: {}]   ;;  %s647_s4 = inlined_call_operand.hbm [shape: f32[8,128], index: 4, kind: output, shape index: {}]  }
   0x1   :  { %v35_v0 = vld [vmem:[%s643_s0] sm:$0xff]  ;;  %v20_v2 = vld [vmem:[%s644_s1 + $0x8] sm:$0xff]  ;;  %v21_v3 = vld [vmem:[%s644_s1 + $0x10] sm:$0xff] }
   0x2   :  { %v19_v1 = vld [vmem:[%s644_s1] sm:$0xff]  ;;  %416 = vmatprep.subr.mxu0 %v35_v0  ;;  %v22_v4 = vld [vmem:[%s644_s1 + $0x18] sm:$0xff] }
   0x3   :  { %418 = vmatprep.mubr.msk.f32.mxu0 %vm36_vm0, %v19_v1  ;;  %417 = vmatpush3.msra.mxu0 %v35_v0  ;;  %v23_v5 = vld [vmem:[%s644_s1 + $0x20] sm:$0xff] }
   0x4   :  { %419 = vmatmul.mubr.msk.f32.vlgmr.msra.gmra.mrb[0].mxu0 %vm36_vm0, %v20_v2 }
   0x5   :  { %421 = vmatprep.mubr.msk.f32.mxu0 %vm36_vm0, %v21_v3 }
   0x6   :  { %10 = vsyncpa [#allocation5], 0  ;;  %v24_v6 = vld [vmem:[%s644_s1 + $0x28] sm:$0xff]  ;;  %v25_v7 = vld [vmem:[%s644_s1 + $0x30] sm:$0xff]  ;;  %v529_v17 = vmov 0.0|0.0   ;;  %vm530_vm1 = vmmov 0   ;;  %v280_v60 = vstv %s646_s3 }
   0x7   :  { %v26_v8 = vld [vmem:[%s644_s1 + $0x38] sm:$0xff]  ;;  %v27_v9 = vld [vmem:[%s644_s1 + $0x40] sm:$0xff]  ;;  %v28_v10 = vld [vmem:[%s644_s1 + $0x48] sm:$0xff]  ;;  %477 = vmatprep.subr.bf16.mxu1 %v529_v17  ;;  %v531_v18 = vmov 0.0   ;;  %s532_s24 = smov [#allocation4]  }
   0x8   :  { %422 = vmatmul.mubr.msk.f32.gmra.mrb[2].mxu0 %vm36_vm0, %v22_v4  ;;  %v29_v11 = vld [vmem:[%s644_s1 + $0x50] sm:$0xff]  ;;  %v30_v12 = vld [vmem:[%s644_s1 + $0x58] sm:$0xff]  ;;  %v31_v13 = vld [vmem:[%s644_s1 + $0x60] sm:$0xff]  ;;  %474 = vmatprep.mubr.msk.f32.mxu1 %vm530_vm1, %v531_v18  ;;  %s358_s25 = sshll.u32 %s532_s24, 4  ;;  %s359_s25 = int_to_ptr.vmem [resolvable:$true] %s358_s25 }
   0x9   :  { %424 = vmatprep.mubr.msk.f32.mxu0 %vm36_vm0, %v23_v5  ;;  %v32_v14 = vld [vmem:[%s644_s1 + $0x68] sm:$0xff]  ;;  %v33_v15 = vld [vmem:[%s644_s1 + $0x70] sm:$0xff]  ;;  %v34_v16 = vld [vmem:[%s644_s1 + $0x78] sm:$0xff]  ;;  %s505_s26 = scalar_lea.vmem %s359_s25, 128  ;;  %p510_p1 = scmp.lt.s32.totalorder %s359_s25, %s359_s25 }
   0xa   :  { %v262_v59 = vld [vmem:[%s645_s2] sm:$0xff]  ;;  %p506_p0 = scmp.ne.s32.totalorder %s359_s25, %s505_s26  ;;  %p511_p2 = scmp.lt.s32.totalorder %s505_s26, %s505_s26 }
   0xc   :  { %425 = vmatmul.mubr.msk.f32.gmra.mrb[4].mxu0 %vm36_vm0, %v24_v6  ;;  %p512_p3 = por %p511_p2, %p510_p1 }
   0xd   :  { %427 = vmatprep.mubr.msk.f32.mxu0 %vm36_vm0, %v25_v7 }
   0xe   :  { %p513_p4 = pnand %p512_p3, %p506_p0 }
  0x10   :  { %428 = vmatmul.mubr.msk.f32.gmra.mrb[6].mxu0 %vm36_vm0, %v26_v8 }
  0x11   :  { %430 = vmatprep.mubr.msk.f32.mxu0 %vm36_vm0, %v27_v9 }
  0x14   :  { %431 = vmatmul.mubr.msk.f32.gmra.mrb[8].mxu0 %vm36_vm0, %v28_v10 }
  0x15   :  { %433 = vmatprep.mubr.msk.f32.mxu0 %vm36_vm0, %v29_v11 }
  0x18   :  { %434 = vmatmul.mubr.msk.f32.gmra.mrb[10].mxu0 %vm36_vm0, %v30_v12 }
  0x19   :  { %436 = vmatprep.mubr.msk.f32.mxu0 %vm36_vm0, %v31_v13 }
  0x1c   :  { %437 = vmatmul.mubr.msk.f32.gmra.mrb[12].mxu0 %vm36_vm0, %v32_v14 }
  0x1d   :  { %439 = vmatprep.mubr.msk.f32.mxu0 %vm36_vm0, %v33_v15 }
  0x20   :  { %440 = vmatmul.mubr.msk.f32.gmra.mrb[14].mxu0 %vm36_vm0, %v34_v16 }
  0xd7   :  { %v420_v19 = vpop.f32.mrb[0].mxu0 }
  0xd8   :  { %v231_v20 = vmax.f32 %v420_v19, 0.0  ;;  %v151_v21 = vpop.f32.mrb[1].mxu0 }
  0xd9   :  { %v230_v22 = vmax.f32 %v151_v21, 0.0 }
  0xdb   :  { %v423_v23 = vpop.f32.mrb[2].mxu0  ;;  %v478_v24 = vpack.c.bf16 %v231_v20, %v230_v22 }
  0xdc   :  { %v233_v25 = vmax.f32 %v423_v23, 0.0  ;;  %v161_v26 = vpop.f32.mrb[3].mxu0 }
  0xdd   :  { %v232_v27 = vmax.f32 %v161_v26, 0.0  ;;  %479 = vmatpush3.bf16.msra.mxu1 %v478_v24 }
  0xde   :  { %480 = vmatprep.subr.bf16.mxu1 %v529_v17 }
  0xdf   :  { %v481_v28 = vpack.c.bf16 %v233_v25, %v232_v27  ;;  %v426_v29 = vpop.f32.mrb[4].mxu0 }
  0xe0   :  { %v235_v30 = vmax.f32 %v426_v29, 0.0  ;;  %v171_v31 = vpop.f32.mrb[5].mxu0 }
  0xe1   :  { %v234_v32 = vmax.f32 %v171_v31, 0.0  ;;  %482 = vmatpush3.bf16.msra.mxu1 %v481_v28 }
  0xe2   :  { %483 = vmatprep.subr.bf16.mxu1 %v529_v17 }
  0xe3   :  { %v484_v33 = vpack.c.bf16 %v235_v30, %v234_v32  ;;  %v429_v34 = vpop.f32.mrb[6].mxu0 }
  0xe4   :  { %v237_v35 = vmax.f32 %v429_v34, 0.0  ;;  %v181_v36 = vpop.f32.mrb[7].mxu0 }
  0xe5   :  { %v236_v37 = vmax.f32 %v181_v36, 0.0  ;;  %485 = vmatpush3.bf16.msra.mxu1 %v484_v33 }
  0xe6   :  { %486 = vmatprep.subr.bf16.mxu1 %v529_v17 }
  0xe7   :  { %v487_v38 = vpack.c.bf16 %v237_v35, %v236_v37  ;;  %v432_v39 = vpop.f32.mrb[8].mxu0 }
  0xe8   :  { %v239_v40 = vmax.f32 %v432_v39, 0.0  ;;  %v191_v41 = vpop.f32.mrb[9].mxu0 }
  0xe9   :  { %v238_v42 = vmax.f32 %v191_v41, 0.0  ;;  %488 = vmatpush3.bf16.msra.mxu1 %v487_v38 }
  0xea   :  { %489 = vmatprep.subr.bf16.mxu1 %v529_v17 }
  0xeb   :  { %v490_v43 = vpack.c.bf16 %v239_v40, %v238_v42  ;;  %v435_v44 = vpop.f32.mrb[10].mxu0 }
  0xec   :  { %v241_v45 = vmax.f32 %v435_v44, 0.0  ;;  %v201_v46 = vpop.f32.mrb[11].mxu0 }
  0xed   :  { %v240_v47 = vmax.f32 %v201_v46, 0.0  ;;  %491 = vmatpush3.bf16.msra.mxu1 %v490_v43 }
  0xee   :  { %492 = vmatprep.subr.bf16.mxu1 %v529_v17 }
  0xef   :  { %v493_v48 = vpack.c.bf16 %v241_v45, %v240_v47  ;;  %v438_v49 = vpop.f32.mrb[12].mxu0 }
  0xf0   :  { %v243_v50 = vmax.f32 %v438_v49, 0.0  ;;  %v211_v51 = vpop.f32.mrb[13].mxu0 }
  0xf1   :  { %v242_v52 = vmax.f32 %v211_v51, 0.0  ;;  %494 = vmatpush3.bf16.msra.mxu1 %v493_v48 }
  0xf2   :  { %495 = vmatprep.subr.bf16.mxu1 %v529_v17 }
  0xf3   :  { %v496_v53 = vpack.c.bf16 %v243_v50, %v242_v52  ;;  %v441_v54 = vpop.f32.mrb[14].mxu0 }
  0xf4   :  { %v245_v55 = vmax.f32 %v441_v54, 0.0  ;;  %v221_v56 = vpop.f32.mrb[15].mxu0 }
  0xf5   :  { %v244_v57 = vmax.f32 %v221_v56, 0.0  ;;  %497 = vmatpush3.bf16.msra.mxu1 %v496_v53 }
  0xf6   :  { %498 = vmatprep.subr.bf16.mxu1 %v529_v17 }
  0xf7   :  { %v499_v58 = vpack.c.bf16 %v245_v55, %v244_v57 }
  0xf9   :  { %500 = vmatpush3.bf16.msra.mxu1 %v499_v58 }
  0xfc   :  { %475 = vmatmul.mubr.f32.vlgmr.msra.gmra.mrb[0].mxu1 %v262_v59 }
 0x1cf   :  { %v347_v61 = vpop.f32.mrb[0].mxu1 }
 0x1d0   :  { %v348_v62 = vadd.f32 %v347_v61, %v280_v60  ;;  %v476_v63 = vpop.f32.mrb[1].mxu1 }
 0x1d2   :  { %351 = vst [vmem:[#allocation4] sm:$0xff] %v348_v62 }
 0x1d3   :  { %516 = shalt.err (!%p513_p4)
}
 0x1d4   :  { %s517_s28 = scalar_lea.hbm %s647_s4, 128 }
 0x1d5   :  { %p518_p5 = scmp.ne.s32.totalorder %s647_s4, %s517_s28  ;;  %p521_p6 = scmp.lt.u32.totalorder %s517_s28, %s647_s4 }
 0x1d7   :  { %p523_p7 = pnand %p521_p6, %p518_p5 }
 0x1d9   :  { %526 = shalt.err (!%p523_p7)
}
 0x1da   :  { %361 = dma.vmem_to_hbm [thread:$0]  %s359_s25, 128, %s647_s4, [#allocation5]  }
 0x1db   :  { %527 = dma.done.wait [#allocation5], 128  }
 0x1dc   :  { %528 = vsyncadd [#allocation5], 4294967168 }
 0x1dd   :  { %365 = vsyncpa [#allocation5], 1 }

</bundles_post_ra>
